<compile_context>
chip_gen: v7x
topology: tpu7x:2x2x1
jax: 0.10.0
libtpu: 0.0.40
codegen_flags: <defaults>
</compile_context>

<pallas_src>
import functools

import jax
import jax.numpy as jnp
from jax import lax
from jax.experimental import pallas as pl
from jax.experimental.pallas import tpu as pltpu


def _densenet_fused_kernel(x_ref, mask_ref, w1_ref, b1_ref, w2_ref, b2_ref,
                           out_ref, patch_ref, *, W, cin_pad, G_pad, steps):
    # x_ref    : (cin_pad, H*W)              one image; channels on sublanes, spatial on lanes
    # mask_ref : (9, H*W)                    {0,1} border masks for the 9 taps of the 3x3 conv
    # w1_ref   : (steps, c1_pad, c_total_pad) 1x1 conv weights (zero-padded input channels)
    # b1_ref   : (steps, c1_pad, 1)
    # w2_ref   : (steps, G_pad, 9*c1_pad)     3x3 conv weights in im2col layout
    # b2_ref   : (steps, G_pad, 1)
    # out_ref  : (c_total_pad, H*W)           running + final concatenated feature map (in place)
    # patch_ref: (9*c1_pad, H*W)              reusable im2col scratch
    HW = x_ref.shape[-1]
    c1_pad = w1_ref.shape[1]

    # ---- init the fixed running feature buffer (out_ref itself) ----
    # Rows that have not been written yet MUST be zero: the padded-K 1x1 matmul reads
    # the whole buffer every step (their weights are zero, but 0 * garbage can be NaN).
    out_ref[...] = jnp.zeros_like(out_ref)
    out_ref[0:cin_pad, :] = x_ref[...]

    # ---- per-tap (static shift, mask) constants, hoisted out of the step loop ----
    taps = []
    k = 0
    for di in (-1, 0, 1):
        for dj in (-1, 0, 1):
            shift = (-(di * W + dj)) % HW                      # static per tap
            if di == 0 and dj == 0:
                taps.append((0, None))                         # center tap: no roll, no mask
            else:
                taps.append((shift, mask_ref[pl.ds(k, 1), :]))  # (1, HW)
            k += 1

    def step(s, carry):
        # ---- 1x1 conv: full padded-K channel matmul on the MXU (no lane slice) ----
        feat = out_ref[...]                                    # (c_total_pad, HW)
        h = jnp.dot(w1_ref[s], feat, preferred_element_type=jnp.float32)
        h = h + b1_ref[s]                                      # (c1_pad, 1) lane-broadcast

        # ---- ELU (alpha = 1.0, PyTorch default); |exp(x)-1 - expm1(x)| < 1.2e-7 ----
        h = jnp.where(h > 0, h, jnp.exp(h) - 1.0)

        # ---- 3x3 conv, stride 1, pad 1: masked lane-rolls -> reusable im2col scratch
        #      at static aligned sublane offsets -> ONE matmul ----
        for t, (shift, mask) in enumerate(taps):
            v = pltpu.roll(h, shift, axis=1) if shift else h
            if mask is not None:
                v = v * mask                                   # zero the out-of-bounds taps
            patch_ref[t * c1_pad:(t + 1) * c1_pad, :] = v
        y = jnp.dot(w2_ref[s], patch_ref[...], preferred_element_type=jnp.float32)
        y = y + b2_ref[s]                                      # (G_pad, HW)

        # ---- torch.cat([x, out], dim=1): write this block in place (aligned offset) ----
        row = pl.multiple_of(cin_pad + s * G_pad, 8)
        out_ref[pl.ds(row, G_pad), :] = y
        return carry

    lax.fori_loop(0, steps, step, None, unroll=steps <= 4)


@jax.jit
def densenet_forward(x_nchw, params):
    """DenseNet forward. x_nchw: (N, Cin, H, W); params: list of (w1, b1, w2, b2)."""
    N, cin, H, W = x_nchw.shape
    HW = H * W
    steps = len(params)
    c1 = params[0][0].shape[1]            # 4 * growth_rate
    growth = params[0][2].shape[3]

    def _rup(v, m):
        return (v + m - 1) // m * m

    cin_pad = _rup(cin, 8)
    g_pad = _rup(growth, 8)
    c1_pad = _rup(c1, 8)
    c_total_pad = cin_pad + steps * g_pad
    c_total = cin + steps * growth

    # NCHW with H,W merged == channels-on-sublanes / spatial-on-lanes (no transposes);
    # pad cin up to a sublane tile so the in-kernel copy is an unmasked full-tile store.
    x2 = jnp.pad(x_nchw.reshape(N, cin, HW), ((0, 0), (0, cin_pad - cin), (0, 0)))

    # ---- pack weights once into fixed, sublane-aligned shapes (zero padding) ----
    w1_list, b1_list, w2_list, b2_list = [], [], [], []
    for s, (w1, b1, w2, b2) in enumerate(params):
        w1_t = w1.T.astype(jnp.float32)                        # (c1, cin + s*growth)
        w1_p = jnp.zeros((c1_pad, c_total_pad), jnp.float32)
        w1_p = w1_p.at[:c1, :cin].set(w1_t[:, :cin])
        for j in range(s):                                     # scatter into padded row layout
            w1_p = w1_p.at[:c1, cin_pad + j * g_pad: cin_pad + j * g_pad + growth].set(
                w1_t[:, cin + j * growth: cin + (j + 1) * growth])
        w1_list.append(w1_p)

        b1_list.append(jnp.zeros((c1_pad, 1), jnp.float32).at[:c1, 0].set(b1.reshape(-1)))

        w2_t = jnp.transpose(w2, (3, 0, 1, 2)).reshape(growth, 9, c1)   # (G, tap, c1)
        w2_p = jnp.zeros((g_pad, 9, c1_pad), jnp.float32).at[:growth, :, :c1].set(w2_t)
        w2_list.append(w2_p.reshape(g_pad, 9 * c1_pad))

        b2_list.append(jnp.zeros((g_pad, 1), jnp.float32).at[:growth, 0].set(b2.reshape(-1)))

    w1_all = jnp.stack(w1_list)           # (steps, c1_pad, c_total_pad)
    b1_all = jnp.stack(b1_list)           # (steps, c1_pad, 1)
    w2_all = jnp.stack(w2_list)           # (steps, g_pad, 9*c1_pad)
    b2_all = jnp.stack(b2_list)           # (steps, g_pad, 1)

    # ---- {0,1} border masks for the 9 taps (zero padding), lane-dense (9, HW) ----
    idx = jnp.arange(HW, dtype=jnp.int32)
    ii, jj = idx // W, idx % W
    masks = []
    for di in (-1, 0, 1):
        for dj in (-1, 0, 1):
            valid = ((ii + di >= 0) & (ii + di < H) &
                     (jj + dj >= 0) & (jj + dj < W))
            masks.append(valid.astype(jnp.float32))
    mask_all = jnp.stack(masks)           # (9, HW)

    kernel = functools.partial(_densenet_fused_kernel, W=W, cin_pad=cin_pad,
                               G_pad=g_pad, steps=steps)

    # ---- VMEM budget (bytes): feature buffer + im2col scratch + double-buffered blocks ----
    f32 = 4
    need_elems = (2 * c_total_pad * HW                 # out block (running buffer), 2 buffers
                  + 2 * cin_pad * HW                   # x block, 2 buffers
                  + 2 * 9 * HW                         # masks
                  + 2 * steps * (c1_pad * c_total_pad + c1_pad
                                 + g_pad * 9 * c1_pad + g_pad)
                  + 9 * c1_pad * HW                    # im2col scratch
                  + 6 * c1_pad * HW)                   # live working set (h, rolls, y)
    vmem_limit = int(min(max(2 * need_elems * f32, 16 << 20), 64 << 20))  # <=64MiB: v7x-safe

    out_padded = pl.pallas_call(
        kernel,
        out_shape=jax.ShapeDtypeStruct((N, c_total_pad, HW), jnp.float32),
        grid=(N,),
        in_specs=[
            pl.BlockSpec((None, cin_pad, HW), lambda n: (n, 0, 0)),
            pl.BlockSpec((9, HW), lambda n: (0, 0)),
            pl.BlockSpec((steps, c1_pad, c_total_pad), lambda n: (0, 0, 0)),
            pl.BlockSpec((steps, c1_pad, 1), lambda n: (0, 0, 0)),
            pl.BlockSpec((steps, g_pad, 9 * c1_pad), lambda n: (0, 0, 0)),
            pl.BlockSpec((steps, g_pad, 1), lambda n: (0, 0, 0)),
        ],
        out_specs=pl.BlockSpec((None, c_total_pad, HW), lambda n: (n, 0, 0)),
        scratch_shapes=[pltpu.VMEM((9 * c1_pad, HW), jnp.float32)],
        compiler_params=pltpu.CompilerParams(
            dimension_semantics=("parallel",),          # both TensorCores on v7x for N >= 2
            vmem_limit_bytes=vmem_limit),
    )(x2, mask_all, w1_all, b1_all, w2_all, b2_all)

    # ---- strip the sublane-alignment padding back to the contiguous torch.cat layout ----
    parts = [out_padded[:, :cin, :]]
    for s in range(steps):
        parts.append(out_padded[:, cin_pad + s * g_pad: cin_pad + s * g_pad + growth, :])
    out = jnp.concatenate(parts, axis=1)
    return out.reshape(N, c_total, H, W)


def init_densenet_params(key, in_channels, growth_rate, steps):
    """Deterministic synthetic parameters (same shapes as the PyTorch module)."""
    params = []
    c = in_channels
    for _ in range(steps):
        c1 = 4 * growth_rate
        key, k1, k2, k3, k4 = jax.random.split(key, 5)
        w1 = jax.random.normal(k1, (c, c1), jnp.float32) * 0.1           # 1x1 conv (Cin, C1)
        b1 = jax.random.normal(k2, (1, c1), jnp.float32) * 0.1
        w2 = jax.random.normal(k3, (3, 3, c1, growth_rate), jnp.float32) * 0.1
        b2 = jax.random.normal(k4, (1, growth_rate), jnp.float32) * 0.1
        params.append((w1, b1, w2, b2))
        c += growth_rate
    return params


# ---------------- pure-JAX reference (for correctness check) ----------------
def _ref_densenet(x_nchw, params):
    x = x_nchw
    for (w1, b1, w2, b2) in params:
        cin = x.shape[1]
        c1 = w1.shape[1]
        g = w2.shape[3]
        w1_oihw = jnp.transpose(w1, (1, 0)).reshape(c1, cin, 1, 1)
        h = lax.conv_general_dilated(x, w1_oihw, (1, 1), "VALID",
                                     dimension_numbers=("NCHW", "OIHW", "NCHW"))
        h = h + b1.reshape(1, c1, 1, 1)
        h = jnp.where(h > 0, h, jnp.exp(h) - 1.0)
        w2_oihw = jnp.transpose(w2, (3, 2, 0, 1))
        o = lax.conv_general_dilated(h, w2_oihw, (1, 1), ((1, 1), (1, 1)),
                                     dimension_numbers=("NCHW", "OIHW", "NCHW"))
        o = o + b2.reshape(1, g, 1, 1)
        x = jnp.concatenate([x, o], axis=1)
    return x


if __name__ == "__main__":
    batch, in_channels, H, W = 2, 4, 16, 16
    growth_rate, steps = 4, 2

    key = jax.random.PRNGKey(0)
    key, kx = jax.random.split(key)
    x = jax.random.normal(kx, (batch, in_channels, H, W), jnp.float32)

    params = init_densenet_params(key, in_channels, growth_rate, steps)

    out = jax.block_until_ready(densenet_forward(x, params))

    expected_channels = in_channels + steps * growth_rate
    assert out.shape == (batch, expected_channels, H, W), out.shape

    ref = jax.block_until_ready(_ref_densenet(x, params))
    assert jnp.allclose(out, ref, rtol=1e-4, atol=1e-4), \
        f"max abs err {jnp.max(jnp.abs(out - ref))}"

    print("KERNEL_OK")
</pallas_src>

<mosaic_0001>
module attributes {stable_mosaic.version = 11 : i64} {
  func.func @_densenet_fused_kernel(%arg0: i32, %arg1: memref<1x8x256xf32, #tpu.memory_space<vmem>>, %arg2: memref<9x256xf32, #tpu.memory_space<vmem>>, %arg3: memref<2x16x24xf32, #tpu.memory_space<vmem>>, %arg4: memref<2x16x1xf32, #tpu.memory_space<vmem>>, %arg5: memref<2x8x144xf32, #tpu.memory_space<vmem>>, %arg6: memref<2x8x1xf32, #tpu.memory_space<vmem>>, %arg7: memref<1x24x256xf32, #tpu.memory_space<vmem>>, %arg8: memref<144x256xf32, #tpu.memory_space<vmem>>) attributes {dimension_semantics = [#tpu.dimension_semantics<parallel>], iteration_bounds = array<i64: 2>, scalar_prefetch = 0 : i64, scratch_operands = 1 : i64, tpu.core_type = #tpu.core_type<tc>, window_params = [{transform_indices = @transform_0, window_bounds = array<i64: 1, 8, 256>}, {pipeline_mode = #tpu.pipeline_mode<synchronous>, transform_indices = @transform_1, window_bounds = array<i64: 9, 256>}, {pipeline_mode = #tpu.pipeline_mode<synchronous>, transform_indices = @transform_2, window_bounds = array<i64: 2, 16, 24>}, {pipeline_mode = #tpu.pipeline_mode<synchronous>, transform_indices = @transform_3, window_bounds = array<i64: 2, 16, 1>}, {pipeline_mode = #tpu.pipeline_mode<synchronous>, transform_indices = @transform_4, window_bounds = array<i64: 2, 8, 144>}, {pipeline_mode = #tpu.pipeline_mode<synchronous>, transform_indices = @transform_5, window_bounds = array<i64: 2, 8, 1>}, {transform_indices = @transform_6, window_bounds = array<i64: 1, 24, 256>}]} {
    %cst = arith.constant 0.000000e+00 : f32
    %0 = vector.broadcast %cst : f32 to vector<24x256xf32>
    %c0 = arith.constant 0 : index
    %c0_0 = arith.constant 0 : index
    %c0_1 = arith.constant 0 : index
    %1 = vector.load %arg7[%c0, %c0_0, %c0_1] : memref<1x24x256xf32, #tpu.memory_space<vmem>>, vector<1x24x256xf32>
    %2 = vector.shape_cast %1 : vector<1x24x256xf32> to vector<24x256xf32>
    %3 = vector.shape_cast %0 : vector<24x256xf32> to vector<1x24x256xf32>
    tpu.vector_store %arg7[%c0, %c0_0, %c0_1], %3 {strides = array<i32>} : memref<1x24x256xf32, #tpu.memory_space<vmem>>, vector<1x24x256xf32>,
    %c0_2 = arith.constant 0 : index
    %c0_3 = arith.constant 0 : index
    %c0_4 = arith.constant 0 : index
    %4 = vector.load %arg1[%c0_2, %c0_3, %c0_4] : memref<1x8x256xf32, #tpu.memory_space<vmem>>, vector<1x8x256xf32>
    %5 = vector.shape_cast %4 : vector<1x8x256xf32> to vector<8x256xf32>
    %c0_5 = arith.constant 0 : index
    %c0_6 = arith.constant 0 : index
    %c0_7 = arith.constant 0 : index
    %6 = vector.load %arg7[%c0_5, %c0_6, %c0_7] : memref<1x24x256xf32, #tpu.memory_space<vmem>>, vector<1x8x256xf32>
    %7 = vector.shape_cast %6 : vector<1x8x256xf32> to vector<8x256xf32>
    %8 = vector.shape_cast %5 : vector<8x256xf32> to vector<1x8x256xf32>
    tpu.vector_store %arg7[%c0_5, %c0_6, %c0_7], %8 {strides = array<i32>} : memref<1x24x256xf32, #tpu.memory_space<vmem>>, vector<1x8x256xf32>,
    %c0_8 = arith.constant 0 : index
    %c0_9 = arith.constant 0 : index
    %9 = vector.load %arg2[%c0_8, %c0_9] : memref<9x256xf32, #tpu.memory_space<vmem>>, vector<1x256xf32>
    %c1 = arith.constant 1 : index
    %c0_10 = arith.constant 0 : index
    %10 = vector.load %arg2[%c1, %c0_10] : memref<9x256xf32, #tpu.memory_space<vmem>>, vector<1x256xf32>
    %c2 = arith.constant 2 : index
    %c0_11 = arith.constant 0 : index
    %11 = vector.load %arg2[%c2, %c0_11] : memref<9x256xf32, #tpu.memory_space<vmem>>, vector<1x256xf32>
    %c3 = arith.constant 3 : index
    %c0_12 = arith.constant 0 : index
    %12 = vector.load %arg2[%c3, %c0_12] : memref<9x256xf32, #tpu.memory_space<vmem>>, vector<1x256xf32>
    %c5 = arith.constant 5 : index
    %c0_13 = arith.constant 0 : index
    %13 = vector.load %arg2[%c5, %c0_13] : memref<9x256xf32, #tpu.memory_space<vmem>>, vector<1x256xf32>
    %c6 = arith.constant 6 : index
    %c0_14 = arith.constant 0 : index
    %14 = vector.load %arg2[%c6, %c0_14] : memref<9x256xf32, #tpu.memory_space<vmem>>, vector<1x256xf32>
    %c7 = arith.constant 7 : index
    %c0_15 = arith.constant 0 : index
    %15 = vector.load %arg2[%c7, %c0_15] : memref<9x256xf32, #tpu.memory_space<vmem>>, vector<1x256xf32>
    %c8 = arith.constant 8 : index
    %c0_16 = arith.constant 0 : index
    %16 = vector.load %arg2[%c8, %c0_16] : memref<9x256xf32, #tpu.memory_space<vmem>>, vector<1x256xf32>
    %c0_i32 = arith.constant 0 : i32
    %c0_17 = arith.constant 0 : index
    %c0_18 = arith.constant 0 : index
    %c0_19 = arith.constant 0 : index
    %17 = vector.load %arg7[%c0_17, %c0_18, %c0_19] : memref<1x24x256xf32, #tpu.memory_space<vmem>>, vector<1x24x256xf32>
    %18 = vector.shape_cast %17 : vector<1x24x256xf32> to vector<24x256xf32>
    %19 = arith.index_cast %c0_i32 : i32 to index
    %c0_20 = arith.constant 0 : index
    %c0_21 = arith.constant 0 : index
    %20 = vector.load %arg3[%19, %c0_20, %c0_21] : memref<2x16x24xf32, #tpu.memory_space<vmem>>, vector<1x16x24xf32>
    %21 = vector.shape_cast %20 : vector<1x16x24xf32> to vector<16x24xf32>
    %cst_22 = arith.constant dense<0.000000e+00> : vector<16x256xf32>
    %22 = tpu.matmul %21, %18, %cst_22 {dimension_numbers = #tpu.dot_dimension_numbers<[1], [0], [0], [1], [0, 0, 1, 1], [], []>} : vector<16x24xf32>, vector<24x256xf32>, vector<16x256xf32> -> vector<16x256xf32>
    %23 = arith.index_cast %c0_i32 : i32 to index
    %c0_23 = arith.constant 0 : index
    %c0_24 = arith.constant 0 : index
    %24 = vector.load %arg4[%23, %c0_23, %c0_24] : memref<2x16x1xf32, #tpu.memory_space<vmem>>, vector<1x16x1xf32>
    %25 = vector.shape_cast %24 : vector<1x16x1xf32> to vector<16x1xf32>
    %26 = vector.broadcast %25 : vector<16x1xf32> to vector<16x256xf32>
    %27 = arith.addf %22, %26 : vector<16x256xf32>
    %cst_25 = arith.constant 0.000000e+00 : f32
    %28 = vector.broadcast %cst_25 : f32 to vector<16x256xf32>
    %29 = arith.cmpf ogt, %27, %28 : vector<16x256xf32>
    %30 = math.exp %27 : vector<16x256xf32>
    %cst_26 = arith.constant 1.000000e+00 : f32
    %31 = vector.broadcast %cst_26 : f32 to vector<16x256xf32>
    %32 = arith.subf %30, %31 : vector<16x256xf32>
    %33 = arith.select %29, %27, %32 : vector<16x256xi1>, vector<16x256xf32>
    %c17_i32 = arith.constant 17 : i32
    %34 = tpu.dynamic_rotate %33 by %c17_i32 dim 1 : vector<16x256xf32>, i32 -> vector<16x256xf32>
    %35 = vector.broadcast %9 : vector<1x256xf32> to vector<16x256xf32>
    %36 = arith.mulf %34, %35 : vector<16x256xf32>
    %c0_27 = arith.constant 0 : index
    %c0_28 = arith.constant 0 : index
    %37 = vector.load %arg8[%c0_27, %c0_28] : memref<144x256xf32, #tpu.memory_space<vmem>>, vector<16x256xf32>
    tpu.vector_store %arg8[%c0_27, %c0_28], %36 {strides = array<i32>} : memref<144x256xf32, #tpu.memory_space<vmem>>, vector<16x256xf32>,
    %c16_i32 = arith.constant 16 : i32
    %38 = tpu.dynamic_rotate %33 by %c16_i32 dim 1 : vector<16x256xf32>, i32 -> vector<16x256xf32>
    %39 = vector.broadcast %10 : vector<1x256xf32> to vector<16x256xf32>
    %40 = arith.mulf %38, %39 : vector<16x256xf32>
    %c16 = arith.constant 16 : index
    %c0_29 = arith.constant 0 : index
    %41 = vector.load %arg8[%c16, %c0_29] : memref<144x256xf32, #tpu.memory_space<vmem>>, vector<16x256xf32>
    tpu.vector_store %arg8[%c16, %c0_29], %40 {strides = array<i32>} : memref<144x256xf32, #tpu.memory_space<vmem>>, vector<16x256xf32>,
    %c15_i32 = arith.constant 15 : i32
    %42 = tpu.dynamic_rotate %33 by %c15_i32 dim 1 : vector<16x256xf32>, i32 -> vector<16x256xf32>
    %43 = vector.broadcast %11 : vector<1x256xf32> to vector<16x256xf32>
    %44 = arith.mulf %42, %43 : vector<16x256xf32>
    %c32 = arith.constant 32 : index
    %c0_30 = arith.constant 0 : index
    %45 = vector.load %arg8[%c32, %c0_30] : memref<144x256xf32, #tpu.memory_space<vmem>>, vector<16x256xf32>
    tpu.vector_store %arg8[%c32, %c0_30], %44 {strides = array<i32>} : memref<144x256xf32, #tpu.memory_space<vmem>>, vector<16x256xf32>,
    %c1_i32 = arith.constant 1 : i32
    %46 = tpu.dynamic_rotate %33 by %c1_i32 dim 1 : vector<16x256xf32>, i32 -> vector<16x256xf32>
    %47 = vector.broadcast %12 : vector<1x256xf32> to vector<16x256xf32>
    %48 = arith.mulf %46, %47 : vector<16x256xf32>
    %c48 = arith.constant 48 : index
    %c0_31 = arith.constant 0 : index
    %49 = vector.load %arg8[%c48, %c0_31] : memref<144x256xf32, #tpu.memory_space<vmem>>, vector<16x256xf32>
    tpu.vector_store %arg8[%c48, %c0_31], %48 {strides = array<i32>} : memref<144x256xf32, #tpu.memory_space<vmem>>, vector<16x256xf32>,
    %c64 = arith.constant 64 : index
    %c0_32 = arith.constant 0 : index
    %50 = vector.load %arg8[%c64, %c0_32] : memref<144x256xf32, #tpu.memory_space<vmem>>, vector<16x256xf32>
    tpu.vector_store %arg8[%c64, %c0_32], %33 {strides = array<i32>} : memref<144x256xf32, #tpu.memory_space<vmem>>, vector<16x256xf32>,
    %c255_i32 = arith.constant 255 : i32
    %51 = tpu.dynamic_rotate %33 by %c255_i32 dim 1 : vector<16x256xf32>, i32 -> vector<16x256xf32>
    %52 = vector.broadcast %13 : vector<1x256xf32> to vector<16x256xf32>
    %53 = arith.mulf %51, %52 : vector<16x256xf32>
    %c80 = arith.constant 80 : index
    %c0_33 = arith.constant 0 : index
    %54 = vector.load %arg8[%c80, %c0_33] : memref<144x256xf32, #tpu.memory_space<vmem>>, vector<16x256xf32>
    tpu.vector_store %arg8[%c80, %c0_33], %53 {strides = array<i32>} : memref<144x256xf32, #tpu.memory_space<vmem>>, vector<16x256xf32>,
    %c241_i32 = arith.constant 241 : i32
    %55 = tpu.dynamic_rotate %33 by %c241_i32 dim 1 : vector<16x256xf32>, i32 -> vector<16x256xf32>
    %56 = vector.broadcast %14 : vector<1x256xf32> to vector<16x256xf32>
    %57 = arith.mulf %55, %56 : vector<16x256xf32>
    %c96 = arith.constant 96 : index
    %c0_34 = arith.constant 0 : index
    %58 = vector.load %arg8[%c96, %c0_34] : memref<144x256xf32, #tpu.memory_space<vmem>>, vector<16x256xf32>
    tpu.vector_store %arg8[%c96, %c0_34], %57 {strides = array<i32>} : memref<144x256xf32, #tpu.memory_space<vmem>>, vector<16x256xf32>,
    %c240_i32 = arith.constant 240 : i32
    %59 = tpu.dynamic_rotate %33 by %c240_i32 dim 1 : vector<16x256xf32>, i32 -> vector<16x256xf32>
    %60 = vector.broadcast %15 : vector<1x256xf32> to vector<16x256xf32>
    %61 = arith.mulf %59, %60 : vector<16x256xf32>
    %c112 = arith.constant 112 : index
    %c0_35 = arith.constant 0 : index
    %62 = vector.load %arg8[%c112, %c0_35] : memref<144x256xf32, #tpu.memory_space<vmem>>, vector<16x256xf32>
    tpu.vector_store %arg8[%c112, %c0_35], %61 {strides = array<i32>} : memref<144x256xf32, #tpu.memory_space<vmem>>, vector<16x256xf32>,
    %c239_i32 = arith.constant 239 : i32
    %63 = tpu.dynamic_rotate %33 by %c239_i32 dim 1 : vector<16x256xf32>, i32 -> vector<16x256xf32>
    %64 = vector.broadcast %16 : vector<1x256xf32> to vector<16x256xf32>
    %65 = arith.mulf %63, %64 : vector<16x256xf32>
    %c128 = arith.constant 128 : index
    %c0_36 = arith.constant 0 : index
    %66 = vector.load %arg8[%c128, %c0_36] : memref<144x256xf32, #tpu.memory_space<vmem>>, vector<16x256xf32>
    tpu.vector_store %arg8[%c128, %c0_36], %65 {strides = array<i32>} : memref<144x256xf32, #tpu.memory_space<vmem>>, vector<16x256xf32>,
    %67 = arith.index_cast %c0_i32 : i32 to index
    %c0_37 = arith.constant 0 : index
    %c0_38 = arith.constant 0 : index
    %68 = vector.load %arg5[%67, %c0_37, %c0_38] : memref<2x8x144xf32, #tpu.memory_space<vmem>>, vector<1x8x144xf32>
    %69 = vector.shape_cast %68 : vector<1x8x144xf32> to vector<8x144xf32>
    %c0_39 = arith.constant 0 : index
    %c0_40 = arith.constant 0 : index
    %70 = vector.load %arg8[%c0_39, %c0_40] : memref<144x256xf32, #tpu.memory_space<vmem>>, vector<144x256xf32>
    %cst_41 = arith.constant dense<0.000000e+00> : vector<8x256xf32>
    %71 = tpu.matmul %69, %70, %cst_41 {dimension_numbers = #tpu.dot_dimension_numbers<[1], [0], [0], [1], [0, 0, 1, 1], [], []>} : vector<8x144xf32>, vector<144x256xf32>, vector<8x256xf32> -> vector<8x256xf32>
    %72 = arith.index_cast %c0_i32 : i32 to index
    %c0_42 = arith.constant 0 : index
    %c0_43 = arith.constant 0 : index
    %73 = vector.load %arg6[%72, %c0_42, %c0_43] : memref<2x8x1xf32, #tpu.memory_space<vmem>>, vector<1x8x1xf32>
    %74 = vector.shape_cast %73 : vector<1x8x1xf32> to vector<8x1xf32>
    %75 = vector.broadcast %74 : vector<8x1xf32> to vector<8x256xf32>
    %76 = arith.addf %71, %75 : vector<8x256xf32>
    %c8_i32 = arith.constant 8 : i32
    %77 = arith.muli %c0_i32, %c8_i32 : i32
    %c8_i32_44 = arith.constant 8 : i32
    %78 = arith.addi %c8_i32_44, %77 : i32
    %79 = tpu.assume_multiple %78, 8 : i32
    %c0_45 = arith.constant 0 : index
    %80 = arith.index_cast %79 : i32 to index
    %c0_46 = arith.constant 0 : index
    %81 = vector.load %arg7[%c0_45, %80, %c0_46] : memref<1x24x256xf32, #tpu.memory_space<vmem>>, vector<1x8x256xf32>
    %82 = vector.shape_cast %81 : vector<1x8x256xf32> to vector<8x256xf32>
    %83 = vector.shape_cast %76 : vector<8x256xf32> to vector<1x8x256xf32>
    tpu.vector_store %arg7[%c0_45, %80, %c0_46], %83 {strides = array<i32>} : memref<1x24x256xf32, #tpu.memory_space<vmem>>, vector<1x8x256xf32>,
    %c1_i32_47 = arith.constant 1 : i32
    %c0_48 = arith.constant 0 : index
    %c0_49 = arith.constant 0 : index
    %c0_50 = arith.constant 0 : index
    %84 = vector.load %arg7[%c0_48, %c0_49, %c0_50] : memref<1x24x256xf32, #tpu.memory_space<vmem>>, vector<1x24x256xf32>
    %85 = vector.shape_cast %84 : vector<1x24x256xf32> to vector<24x256xf32>
    %86 = arith.index_cast %c1_i32_47 : i32 to index
    %c0_51 = arith.constant 0 : index
    %c0_52 = arith.constant 0 : index
    %87 = vector.load %arg3[%86, %c0_51, %c0_52] : memref<2x16x24xf32, #tpu.memory_space<vmem>>, vector<1x16x24xf32>
    %88 = vector.shape_cast %87 : vector<1x16x24xf32> to vector<16x24xf32>
    %cst_53 = arith.constant dense<0.000000e+00> : vector<16x256xf32>
    %89 = tpu.matmul %88, %85, %cst_53 {dimension_numbers = #tpu.dot_dimension_numbers<[1], [0], [0], [1], [0, 0, 1, 1], [], []>} : vector<16x24xf32>, vector<24x256xf32>, vector<16x256xf32> -> vector<16x256xf32>
    %90 = arith.index_cast %c1_i32_47 : i32 to index
    %c0_54 = arith.constant 0 : index
    %c0_55 = arith.constant 0 : index
    %91 = vector.load %arg4[%90, %c0_54, %c0_55] : memref<2x16x1xf32, #tpu.memory_space<vmem>>, vector<1x16x1xf32>
    %92 = vector.shape_cast %91 : vector<1x16x1xf32> to vector<16x1xf32>
    %93 = vector.broadcast %92 : vector<16x1xf32> to vector<16x256xf32>
    %94 = arith.addf %89, %93 : vector<16x256xf32>
    %cst_56 = arith.constant 0.000000e+00 : f32
    %95 = vector.broadcast %cst_56 : f32 to vector<16x256xf32>
    %96 = arith.cmpf ogt, %94, %95 : vector<16x256xf32>
    %97 = math.exp %94 : vector<16x256xf32>
    %cst_57 = arith.constant 1.000000e+00 : f32
    %98 = vector.broadcast %cst_57 : f32 to vector<16x256xf32>
    %99 = arith.subf %97, %98 : vector<16x256xf32>
    %100 = arith.select %96, %94, %99 : vector<16x256xi1>, vector<16x256xf32>
    %c17_i32_58 = arith.constant 17 : i32
    %101 = tpu.dynamic_rotate %100 by %c17_i32_58 dim 1 : vector<16x256xf32>, i32 -> vector<16x256xf32>
    %102 = vector.broadcast %9 : vector<1x256xf32> to vector<16x256xf32>
    %103 = arith.mulf %101, %102 : vector<16x256xf32>
    %c0_59 = arith.constant 0 : index
    %c0_60 = arith.constant 0 : index
    %104 = vector.load %arg8[%c0_59, %c0_60] : memref<144x256xf32, #tpu.memory_space<vmem>>, vector<16x256xf32>
    tpu.vector_store %arg8[%c0_59, %c0_60], %103 {strides = array<i32>} : memref<144x256xf32, #tpu.memory_space<vmem>>, vector<16x256xf32>,
    %c16_i32_61 = arith.constant 16 : i32
    %105 = tpu.dynamic_rotate %100 by %c16_i32_61 dim 1 : vector<16x256xf32>, i32 -> vector<16x256xf32>
    %106 = vector.broadcast %10 : vector<1x256xf32> to vector<16x256xf32>
    %107 = arith.mulf %105, %106 : vector<16x256xf32>
    %c16_62 = arith.constant 16 : index
    %c0_63 = arith.constant 0 : index
    %108 = vector.load %arg8[%c16_62, %c0_63] : memref<144x256xf32, #tpu.memory_space<vmem>>, vector<16x256xf32>
    tpu.vector_store %arg8[%c16_62, %c0_63], %107 {strides = array<i32>} : memref<144x256xf32, #tpu.memory_space<vmem>>, vector<16x256xf32>,
    %c15_i32_64 = arith.constant 15 : i32
    %109 = tpu.dynamic_rotate %100 by %c15_i32_64 dim 1 : vector<16x256xf32>, i32 -> vector<16x256xf32>
    %110 = vector.broadcast %11 : vector<1x256xf32> to vector<16x256xf32>
    %111 = arith.mulf %109, %110 : vector<16x256xf32>
    %c32_65 = arith.constant 32 : index
    %c0_66 = arith.constant 0 : index
    %112 = vector.load %arg8[%c32_65, %c0_66] : memref<144x256xf32, #tpu.memory_space<vmem>>, vector<16x256xf32>
    tpu.vector_store %arg8[%c32_65, %c0_66], %111 {strides = array<i32>} : memref<144x256xf32, #tpu.memory_space<vmem>>, vector<16x256xf32>,
    %c1_i32_67 = arith.constant 1 : i32
    %113 = tpu.dynamic_rotate %100 by %c1_i32_67 dim 1 : vector<16x256xf32>, i32 -> vector<16x256xf32>
    %114 = vector.broadcast %12 : vector<1x256xf32> to vector<16x256xf32>
    %115 = arith.mulf %113, %114 : vector<16x256xf32>
    %c48_68 = arith.constant 48 : index
    %c0_69 = arith.constant 0 : index
    %116 = vector.load %arg8[%c48_68, %c0_69] : memref<144x256xf32, #tpu.memory_space<vmem>>, vector<16x256xf32>
    tpu.vector_store %arg8[%c48_68, %c0_69], %115 {strides = array<i32>} : memref<144x256xf32, #tpu.memory_space<vmem>>, vector<16x256xf32>,
    %c64_70 = arith.constant 64 : index
    %c0_71 = arith.constant 0 : index
    %117 = vector.load %arg8[%c64_70, %c0_71] : memref<144x256xf32, #tpu.memory_space<vmem>>, vector<16x256xf32>
    tpu.vector_store %arg8[%c64_70, %c0_71], %100 {strides = array<i32>} : memref<144x256xf32, #tpu.memory_space<vmem>>, vector<16x256xf32>,
    %c255_i32_72 = arith.constant 255 : i32
    %118 = tpu.dynamic_rotate %100 by %c255_i32_72 dim 1 : vector<16x256xf32>, i32 -> vector<16x256xf32>
    %119 = vector.broadcast %13 : vector<1x256xf32> to vector<16x256xf32>
    %120 = arith.mulf %118, %119 : vector<16x256xf32>
    %c80_73 = arith.constant 80 : index
    %c0_74 = arith.constant 0 : index
    %121 = vector.load %arg8[%c80_73, %c0_74] : memref<144x256xf32, #tpu.memory_space<vmem>>, vector<16x256xf32>
    tpu.vector_store %arg8[%c80_73, %c0_74], %120 {strides = array<i32>} : memref<144x256xf32, #tpu.memory_space<vmem>>, vector<16x256xf32>,
    %c241_i32_75 = arith.constant 241 : i32
    %122 = tpu.dynamic_rotate %100 by %c241_i32_75 dim 1 : vector<16x256xf32>, i32 -> vector<16x256xf32>
    %123 = vector.broadcast %14 : vector<1x256xf32> to vector<16x256xf32>
    %124 = arith.mulf %122, %123 : vector<16x256xf32>
    %c96_76 = arith.constant 96 : index
    %c0_77 = arith.constant 0 : index
    %125 = vector.load %arg8[%c96_76, %c0_77] : memref<144x256xf32, #tpu.memory_space<vmem>>, vector<16x256xf32>
    tpu.vector_store %arg8[%c96_76, %c0_77], %124 {strides = array<i32>} : memref<144x256xf32, #tpu.memory_space<vmem>>, vector<16x256xf32>,
    %c240_i32_78 = arith.constant 240 : i32
    %126 = tpu.dynamic_rotate %100 by %c240_i32_78 dim 1 : vector<16x256xf32>, i32 -> vector<16x256xf32>
    %127 = vector.broadcast %15 : vector<1x256xf32> to vector<16x256xf32>
    %128 = arith.mulf %126, %127 : vector<16x256xf32>
    %c112_79 = arith.constant 112 : index
    %c0_80 = arith.constant 0 : index
    %129 = vector.load %arg8[%c112_79, %c0_80] : memref<144x256xf32, #tpu.memory_space<vmem>>, vector<16x256xf32>
    tpu.vector_store %arg8[%c112_79, %c0_80], %128 {strides = array<i32>} : memref<144x256xf32, #tpu.memory_space<vmem>>, vector<16x256xf32>,
    %c239_i32_81 = arith.constant 239 : i32
    %130 = tpu.dynamic_rotate %100 by %c239_i32_81 dim 1 : vector<16x256xf32>, i32 -> vector<16x256xf32>
    %131 = vector.broadcast %16 : vector<1x256xf32> to vector<16x256xf32>
    %132 = arith.mulf %130, %131 : vector<16x256xf32>
    %c128_82 = arith.constant 128 : index
    %c0_83 = arith.constant 0 : index
    %133 = vector.load %arg8[%c128_82, %c0_83] : memref<144x256xf32, #tpu.memory_space<vmem>>, vector<16x256xf32>
    tpu.vector_store %arg8[%c128_82, %c0_83], %132 {strides = array<i32>} : memref<144x256xf32, #tpu.memory_space<vmem>>, vector<16x256xf32>,
    %134 = arith.index_cast %c1_i32_47 : i32 to index
    %c0_84 = arith.constant 0 : index
    %c0_85 = arith.constant 0 : index
    %135 = vector.load %arg5[%134, %c0_84, %c0_85] : memref<2x8x144xf32, #tpu.memory_space<vmem>>, vector<1x8x144xf32>
    %136 = vector.shape_cast %135 : vector<1x8x144xf32> to vector<8x144xf32>
    %c0_86 = arith.constant 0 : index
    %c0_87 = arith.constant 0 : index
    %137 = vector.load %arg8[%c0_86, %c0_87] : memref<144x256xf32, #tpu.memory_space<vmem>>, vector<144x256xf32>
    %cst_88 = arith.constant dense<0.000000e+00> : vector<8x256xf32>
    %138 = tpu.matmul %136, %137, %cst_88 {dimension_numbers = #tpu.dot_dimension_numbers<[1], [0], [0], [1], [0, 0, 1, 1], [], []>} : vector<8x144xf32>, vector<144x256xf32>, vector<8x256xf32> -> vector<8x256xf32>
    %139 = arith.index_cast %c1_i32_47 : i32 to index
    %c0_89 = arith.constant 0 : index
    %c0_90 = arith.constant 0 : index
    %140 = vector.load %arg6[%139, %c0_89, %c0_90] : memref<2x8x1xf32, #tpu.memory_space<vmem>>, vector<1x8x1xf32>
    %141 = vector.shape_cast %140 : vector<1x8x1xf32> to vector<8x1xf32>
    %142 = vector.broadcast %141 : vector<8x1xf32> to vector<8x256xf32>
    %143 = arith.addf %138, %142 : vector<8x256xf32>
    %c8_i32_91 = arith.constant 8 : i32
    %144 = arith.muli %c1_i32_47, %c8_i32_91 : i32
    %c8_i32_92 = arith.constant 8 : i32
    %145 = arith.addi %c8_i32_92, %144 : i32
    %146 = tpu.assume_multiple %145, 8 : i32
    %c0_93 = arith.constant 0 : index
    %147 = arith.index_cast %146 : i32 to index
    %c0_94 = arith.constant 0 : index
    %148 = vector.load %arg7[%c0_93, %147, %c0_94] : memref<1x24x256xf32, #tpu.memory_space<vmem>>, vector<1x8x256xf32>
    %149 = vector.shape_cast %148 : vector<1x8x256xf32> to vector<8x256xf32>
    %150 = vector.shape_cast %143 : vector<8x256xf32> to vector<1x8x256xf32>
    tpu.vector_store %arg7[%c0_93, %147, %c0_94], %150 {strides = array<i32>} : memref<1x24x256xf32, #tpu.memory_space<vmem>>, vector<1x8x256xf32>,
    %c2_i32 = arith.constant 2 : i32
    return
  }
  func.func @transform_0(%arg0: i32) -> (i32, i32, i32) {
    %c0_i32 = arith.constant 0 : i32
    %c0_i32_0 = arith.constant 0 : i32
    %c0_i32_1 = arith.constant 0 : i32
    return %arg0, %c0_i32, %c0_i32_0 : i32, i32, i32
  }
  func.func @transform_1(%arg0: i32) -> (i32, i32) {
    %c0_i32 = arith.constant 0 : i32
    %c0_i32_0 = arith.constant 0 : i32
    %c0_i32_1 = arith.constant 0 : i32
    return %c0_i32, %c0_i32_0 : i32, i32
  }
  func.func @transform_2(%arg0: i32) -> (i32, i32, i32) {
    %c0_i32 = arith.constant 0 : i32
    %c0_i32_0 = arith.constant 0 : i32
    %c0_i32_1 = arith.constant 0 : i32
    %c0_i32_2 = arith.constant 0 : i32
    return %c0_i32, %c0_i32_0, %c0_i32_1 : i32, i32, i32
  }
  func.func @transform_3(%arg0: i32) -> (i32, i32, i32) {
    %c0_i32 = arith.constant 0 : i32
    %c0_i32_0 = arith.constant 0 : i32
    %c0_i32_1 = arith.constant 0 : i32
    %c0_i32_2 = arith.constant 0 : i32
    return %c0_i32, %c0_i32_0, %c0_i32_1 : i32, i32, i32
  }
  func.func @transform_4(%arg0: i32) -> (i32, i32, i32) {
    %c0_i32 = arith.constant 0 : i32
    %c0_i32_0 = arith.constant 0 : i32
    %c0_i32_1 = arith.constant 0 : i32
    %c0_i32_2 = arith.constant 0 : i32
    return %c0_i32, %c0_i32_0, %c0_i32_1 : i32, i32, i32
  }
  func.func @transform_5(%arg0: i32) -> (i32, i32, i32) {
    %c0_i32 = arith.constant 0 : i32
    %c0_i32_0 = arith.constant 0 : i32
    %c0_i32_1 = arith.constant 0 : i32
    %c0_i32_2 = arith.constant 0 : i32
    return %c0_i32, %c0_i32_0, %c0_i32_1 : i32, i32, i32
  }
  func.func @transform_6(%arg0: i32) -> (i32, i32, i32) {
    %c0_i32 = arith.constant 0 : i32
    %c0_i32_0 = arith.constant 0 : i32
    %c0_i32_1 = arith.constant 0 : i32
    return %arg0, %c0_i32, %c0_i32_0 : i32, i32, i32
  }
}

</mosaic_0001>

<bundles_post_ra>
// kernel: densenet_forward.1
= control target key start
LH: loop header
LB: loop body
LE: loop exit
PB: predicated region body
PF: predicated region fallthrough
CT: control target
= control target key end

     0   :  { %s1471_s21 = smov 0   ;;  %s2070_s0 = inlined_call_operand.vmem [shape: f32[2,8,256], index: 0, kind: input, shape index: {}]   ;;  %s2071_s1 = inlined_call_operand.vmem [shape: f32[9,256], index: 1, kind: input, shape index: {}]   ;;  %s2072_s2 = inlined_call_operand.vmem [shape: f32[2,16,24], index: 2, kind: input, shape index: {}]   ;;  %s2073_s3 = inlined_call_operand.vmem [shape: f32[2,16,1], index: 3, kind: input, shape index: {}]   ;;  %s2074_s4 = inlined_call_operand.vmem [shape: f32[2,8,144], index: 4, kind: input, shape index: {}]   ;;  %s2075_s5 = inlined_call_operand.vmem [shape: f32[2,8,1], index: 5, kind: input, shape index: {}]   ;;  %s2076_s6 = inlined_call_operand.vmem [shape: f32[2,24,256], index: 6, kind: output, shape index: {}]  }
   0x1 LB: > { %s1258_s22 = sadd.s32 4294967295, %s1424_s21   ;;  %p1262_p0 = scmp.ge.s32.totalorder %s1424_s21, 1  ;;  %s1424_s21 = sphi %s1471_s21, %s16_s21  }
   0x2   : > { %p212_p1 = scmp.lt.s32.totalorder %s1424_s21, 3 }
   0x4   : > { %p213_p2 = pnand %p1262_p0, %p212_p1 }
   0x5   : > { %p242_p3 = scmp.lt.s32.totalorder (!%p213_p2), %s1258_s22, 1  ;;  %v1426_v0 = vmov (!%p213_p2), 0.0   ;;  %v1427_v1 = vmov (!%p213_p2), 0   ;;  %v285_v2 = vld [vmem:[%s2073_s3] sm:$0xff] (!%p213_p2)  ;;  %v286_v3 = vld [vmem:[%s2073_s3 + $0x8] sm:$0xff] (!%p213_p2)  ;;  %vm297_vm0 = vcmask (!%p213_p2), 195584   ;;  %v409_v51 = vlaneseq (!%p213_p2) }
   0x6   : > { %216 = sbr.rel (%p213_p2) target bundleno = 1300 (0x514), region = 44  ;;  %368 = vmatprep.mubr.f32.mxu1 (!%p213_p2), %v1426_v0  ;;  %1400 = vset.pattern.permute.xlu0 (!%p213_p2), %v1427_v1  ;;  %v283_v8 = vld [vmem:[%s2072_s2] sm:$0xff] (!%p213_p2)  ;;  %v284_v9 = vld [vmem:[%s2072_s2 + $0x8] sm:$0xff] (!%p213_p2)  ;;  %s1428_s15 = smov (!%p213_p2), 16   ;;  %vm707_vm5 = vcmask (!%p213_p2), 130048   ;;  %v1285_v40 = vld [vmem:[%s2073_s3 + $0x18] sm:$0xff] (!%p213_p2) }
   0x7   : > { %289 = vperm.xlu0 (!%p213_p2), %1400, %v285_v2   ;;  %879 = vmatprep.mubr.f32.mxu0 (!%p213_p2), %v1426_v0  ;;  %s1429_s16 = smov (!%p213_p2), 17   ;;  %s1430_s17 = smov (!%p213_p2), 15   ;;  %v701_v38 = vld [vmem:[%s2075_s5] sm:$0xff] (!%p213_p2)  ;;  %v664_v39 = vld [vmem:[%s2074_s4 + $0x8] sm:$0xff] (!%p213_p2)  ;;  %v418_v54 = vshrl.u32 (!%p213_p2), %v409_v51, 7  ;;  %v1616_v55 = vand.u32 (!%p213_p2), 127, %v409_v51 }
   0x8   : > { %1401 = vset.pattern.permute.xlu1 (!%p213_p2), %v1427_v1  ;;  %s1431_s18 = smov (!%p213_p2), 1   ;;  %s1432_s19 = smov (!%p213_p2), 127   ;;  %v262_v60 = vld [vmem:[%s2071_s1] ss:$8 sm:$0x3] (!%p213_p2) }
   0x9   : > { %s1433_s20 = smov (!%p213_p2), 113   ;;  %s1435_s23 = smov (!%p213_p2), 111   ;;  %v1620_v58 = vsub.s32 (!%p213_p2), 0, %v418_v54  ;;  %v1622_v59 = vsub.s32 (!%p213_p2), 1, %v418_v54  ;;  %vm411_vm6 = vcmp.lt.s32.totalorder (!%p213_p2), %v1616_v55, 17  ;;  %vm443_vm7 = vcmp.lt.s32.totalorder (!%p213_p2), %v1616_v55, 16 }
   0xa   : > { %v1266_v2 = vld [vmem:[%s2071_s1 + $0x1] ss:$8 sm:$0x3] (!%p213_p2)  ;;  %vm475_vm8 = vcmp.lt.s32.totalorder (!%p213_p2), %v1616_v55, 15  ;;  %vm507_vm9 = vcmp.lt.s32.totalorder (!%p213_p2), %v1616_v55, 1  ;;  %vm543_vm10 = vcmp.lt.s32.totalorder (!%p213_p2), %v1616_v55, 127 }
   0xb   : > { %294 = vperm.xlu0 (!%p213_p2), %1400, %v286_v3   ;;  %v1631_v63 = vrot.slane (!%p213_p2), %v262_v60, %v1620_v58  ;;  %v1634_v1 = vrot.slane (!%p213_p2), %v262_v60, %v1622_v59  ;;  %vm575_vm11 = vcmp.lt.s32.totalorder (!%p213_p2), %v1616_v55, 113  ;;  %vm607_vm12 = vcmp.lt.s32.totalorder (!%p213_p2), %v1616_v55, 112 }
   0xc   : > { %vm639_vm13 = vcmp.lt.s32.totalorder (!%p213_p2), %v1616_v55, 111  ;;  %v1292_v55 = vld [vmem:[%s2074_s4 + $0x10] sm:$0xff] (!%p213_p2) }
   0xd   : > { %s2078_s22 = smov (!%p242_p3, %s1258_s22), 1 }
   0xe   : > { %s1300_s27 = sshll.u32 %s2078_s22, 4  ;;  %s1381_s28 = smul.u32 48, %s2078_s22 }
   0xf   : > { %s246_s7 = scalar_lea.vmem %s2070_s0, %s1300_s27  ;;  %s1434_s22 = smov 112  }
  0x10   : > { %s1493_s10 = scalar_lea.vmem %s2076_s6, %s1381_s28  ;;  %v1495_v4 = vld [vmem:[%s246_s7 + $0x8] sm:$0xff]  ;;  %v1497_v5 = vld [vmem:[%s246_s7] sm:$0xff] }
  0x11   : > { %261 = vst [vmem:[%s1493_s10 + $0x8] sm:$0xff] %v1495_v4  ;;  %v1301_v6 = vpack.c.bf16 %v1426_v0, %v1495_v4  ;;  %260 = vst [vmem:[%s1493_s10] sm:$0xff] %v1497_v5  ;;  %v1303_v7 = vpack.c.bf16 %v1426_v0, %v1497_v5 }
  0x13   : > { %1302 = vmatprep.subr.bf16.mxu1 %v1301_v6 }
  0x14   : > { %1304 = vmatpush1.bf16.msra.mxu1 %v1303_v7 }
  0x15   : > { %308 = vmatprep.subr.mxu1 %v1426_v0 }
  0x18   : > { %309 = vmatpush1.msra.mxu1 %v1426_v0 }
  0x19   : > { %1273 = vmatmul.mubr.msk.f32.vlgmr.msra.gmra.mrb[0].mxu1 %vm297_vm0, %v283_v8 }
  0x1a   : > { %374 = vmatprep.mubr.f32.mxu1 %v1426_v0 }
  0x1d   : > { %1274 = vmatmul.mubr.msk.f32.gmra.mrb[2].mxu1 %vm297_vm0, %v284_v9  ;;  %v1645_v9 = vrot.slane %v1266_v2, %v1620_v58 }
  0x1e   : > { %1279 = vmatprep.mubr.msk.f32.mxu1 %vm707_vm5, %v664_v39 }
  0x86   : > { %v290_v10 = vpop.permute.xlu0 %289 }
  0x8a   : > { %v295_v16 = vpop.permute.xlu0 %294 }
  0xec   : > { %v370_v11 = vpop.f32.mrb[0].mxu1 }
  0xed   : > { %v371_v12 = vadd.f32 %v370_v11, %v290_v10  ;;  %v372_v13 = vpop.f32.mrb[1].mxu1 }
  0xee   : > { %v373_v14 = vadd.f32 %v372_v13, %v290_v10  ;;  %v1648_v10 = vrot.slane %v1266_v2, %v1622_v59 }
  0xef   : > { %v385_v15 = vmul.f32 1.442695, %v371_v12  ;;  %vm381_vm1 = vcmp.gt.f32.partialorder %v371_v12, 0.0 }
  0xf0   : > { %v387_v17 = vmul.f32 1.442695, %v373_v14  ;;  %v376_v18 = vpop.f32.mrb[2].mxu1  ;;  %vm382_vm3 = vcmp.gt.f32.partialorder %v373_v14, 0.0 }
  0xf1   : > { %1402 = vpow2.f32 %v385_v15  ;;  %v377_v19 = vadd.f32 %v376_v18, %v295_v16  ;;  %v378_v20 = vpop.f32.mrb[3].mxu1  ;;  %v1267_v15 = vld [vmem:[%s2071_s1 + $0x2] ss:$8 sm:$0x3] }
  0xf2   : > { %1404 = vpow2.f32 %v387_v17  ;;  %v379_v21 = vadd.f32 %v378_v20, %v295_v16 }
  0xf3   : > { %v389_v22 = vmul.f32 1.442695, %v377_v19  ;;  %vm383_vm2 = vcmp.gt.f32.partialorder %v377_v19, 0.0 }
  0xf4   : > { %v391_v23 = vmul.f32 1.442695, %v379_v21  ;;  %vm384_vm4 = vcmp.gt.f32.partialorder %v379_v21, 0.0 }
  0xf5   : > { %1406 = vpow2.f32 %v389_v22 }
  0xf6   : > { %1408 = vpow2.f32 %v391_v23 }
  0xfb   : > { %v1403_v24 = vpop.eup %1402 }
  0xfc   : > { %v1405_v25 = vpop.eup %1404  ;;  %v1275_v26 = vadd.f32 -1.0, %v1403_v24  ;;  %v1667_v24 = vrot.slane %v1267_v15, %v1620_v58 }
  0xfd   : > { %v1276_v29 = vadd.f32 -1.0, %v1405_v25  ;;  %v1670_v25 = vrot.slane %v1267_v15, %v1622_v59 }
  0xfe   : > { %v1518_v27 = vsel %vm381_vm1, %v371_v12, %v1275_v26 }
  0xff   : > { %v1407_v28 = vpop.eup %1406  ;;  %435 = vrot.lane.b32.xlu0 %v1518_v27, %s1428_s15  ;;  %401 = vrot.lane.b32.xlu1 %v1518_v27, %s1429_s16  ;;  %v1526_v34 = vsel %vm382_vm3, %v373_v14, %v1276_v29 }
 0x100   : > { %v1409_v30 = vpop.eup %1408  ;;  %v1277_v31 = vadd.f32 -1.0, %v1407_v28 }
 0x101   : > { %v1278_v32 = vadd.f32 -1.0, %v1409_v30 }
 0x102   : > { %v1524_v33 = vsel %vm383_vm2, %v377_v19, %v1277_v31  ;;  %v1268_v31 = vld [vmem:[%s2071_s1 + $0x3] ss:$8 sm:$0x3] }
 0x103   : > { %v1528_v35 = vsel %vm384_vm4, %v379_v21, %v1278_v32  ;;  %467 = vrot.lane.b32.xlu0 %v1518_v27, %s1430_s17  ;;  %403 = vrot.lane.b32.xlu1 %v1524_v33, %s1429_s16  ;;  %v1323_v36 = vpack.c.bf16 %v1524_v33, %v1518_v27  ;;  %v1691_v51 = vrot.slane %v1268_v31, %v1620_v58 }
 0x104   : > { %v1321_v37 = vpack.c.bf16 %v1528_v35, %v1526_v34  ;;  %v1694_v54 = vrot.slane %v1268_v31, %v1622_v59 }
 0x107   : > { %499 = vrot.lane.b32.xlu0 %v1518_v27, %s1431_s18  ;;  %437 = vrot.lane.b32.xlu1 %v1524_v33, %s1428_s15 }
 0x10b   : > { %535 = vrot.lane.b32.xlu0 %v1518_v27, %s1432_s19  ;;  %469 = vrot.lane.b32.xlu1 %v1524_v33, %s1430_s17 }
 0x10f   : > { %567 = vrot.lane.b32.xlu0 %v1518_v27, %s1433_s20  ;;  %501 = vrot.lane.b32.xlu1 %v1524_v33, %s1431_s18 }
 0x113   : > { %599 = vrot.lane.b32.xlu0 %v1518_v27, %s1434_s22  ;;  %537 = vrot.lane.b32.xlu1 %v1524_v33, %s1432_s19 }
 0x117   : > { %405 = vrot.lane.b32.xlu0 %v1526_v34, %s1429_s16  ;;  %569 = vrot.lane.b32.xlu1 %v1524_v33, %s1433_s20 }
 0x11b   : > { %439 = vrot.lane.b32.xlu0 %v1526_v34, %s1428_s15  ;;  %601 = vrot.lane.b32.xlu1 %v1524_v33, %s1434_s22 }
 0x11f   : > { %471 = vrot.lane.b32.xlu0 %v1526_v34, %s1430_s17  ;;  %407 = vrot.lane.b32.xlu1 %v1528_v35, %s1429_s16 }
 0x123   : > { %503 = vrot.lane.b32.xlu0 %v1526_v34, %s1431_s18  ;;  %441 = vrot.lane.b32.xlu1 %v1528_v35, %s1428_s15 }
 0x127   : > { %631 = vrot.lane.b32.xlu0 %v1518_v27, %s1435_s23  ;;  %473 = vrot.lane.b32.xlu1 %v1528_v35, %s1430_s17 }
 0x12b   : > { %539 = vrot.lane.b32.xlu0 %v1526_v34, %s1432_s19  ;;  %505 = vrot.lane.b32.xlu1 %v1528_v35, %s1431_s18 }
 0x12f   : > { %571 = vrot.lane.b32.xlu0 %v1526_v34, %s1433_s20  ;;  %633 = vrot.lane.b32.xlu1 %v1524_v33, %s1435_s23 }
 0x133   : > { %603 = vrot.lane.b32.xlu0 %v1526_v34, %s1434_s22  ;;  %541 = vrot.lane.b32.xlu1 %v1528_v35, %s1432_s19 }
 0x137   : > { %635 = vrot.lane.b32.xlu0 %v1526_v34, %s1435_s23  ;;  %573 = vrot.lane.b32.xlu1 %v1528_v35, %s1433_s20 }
 0x13b   : > { %704 = vperm.xlu0 %1400, %v701_v38   ;;  %605 = vrot.lane.b32.xlu1 %v1528_v35, %s1434_s22 }
 0x13f   : > { %806 = vperm.xlu0 %1400, %v1285_v40   ;;  %637 = vrot.lane.b32.xlu1 %v1528_v35, %s1435_s23  ;;  %v1271_v35 = vld [vmem:[%s2071_s1 + $0x7] ss:$8 sm:$0x3] }
 0x171   : > { %v436_v41 = vpop.permute.xlu0 %435  ;;  %v402_v42 = vpop.permute.xlu1 %401 }
 0x175   : > { %v468_v43 = vpop.permute.xlu0 %467  ;;  %v404_v44 = vpop.permute.xlu1 %403 }
 0x179   : > { %v1604_v45 = vpop.permute.xlu0 %499  ;;  %v438_v46 = vpop.permute.xlu1 %437 }
 0x17d   : > { %v1606_v47 = vpop.permute.xlu0 %535  ;;  %v470_v48 = vpop.permute.xlu1 %469 }
 0x181   : > { %v1608_v49 = vpop.permute.xlu0 %567  ;;  %v1610_v50 = vpop.permute.xlu1 %501 }
 0x185   : > { %v1612_v52 = vpop.permute.xlu0 %599  ;;  %v1614_v53 = vpop.permute.xlu1 %537 }
 0x189   : > { %v406_v56 = vpop.permute.xlu0 %405  ;;  %v1618_v57 = vpop.permute.xlu1 %569 }
 0x18a   : > { %v412_v3 = vsel %vm411_vm6, %v402_v42, %v406_v56  ;;  %v414_v6 = vsel %vm411_vm6, %v406_v56, %v402_v42 }
 0x18b   : > { %v427_v13 = vmul.f32 %v1631_v63, %v414_v6  ;;  %v428_v14 = vmul.f32 %v1634_v1, %v412_v3 }
 0x18d   : > { %v440_v61 = vpop.permute.xlu0 %439  ;;  %v1628_v62 = vpop.permute.xlu1 %601 }
 0x18e   : > { %v444_v18 = vsel %vm443_vm7, %v436_v41, %v440_v61  ;;  %v446_v19 = vsel %vm443_vm7, %v440_v61, %v436_v41 }
 0x18f   : > { %v459_v29 = vmul.f32 %v1645_v9, %v446_v19  ;;  %v460_v30 = vmul.f32 %v1648_v10, %v444_v18  ;;  %v1269_v18 = vld [vmem:[%s2071_s1 + $0x5] ss:$8 sm:$0x3] }
 0x191   : > { %v472_v7 = vpop.permute.xlu0 %471  ;;  %v408_v8 = vpop.permute.xlu1 %407 }
 0x192   : > { %v413_v11 = vsel %vm411_vm6, %v404_v44, %v408_v8  ;;  %v415_v12 = vsel %vm411_vm6, %v408_v8, %v404_v44  ;;  %v476_v39 = vsel %vm475_vm8, %v468_v43, %v472_v7  ;;  %v478_v40 = vsel %vm475_vm8, %v472_v7, %v468_v43 }
 0x193   : > { %v429_v16 = vmul.f32 %v1631_v63, %v415_v12  ;;  %v430_v17 = vmul.f32 %v1634_v1, %v413_v11  ;;  %v491_v60 = vmul.f32 %v1667_v24, %v478_v40  ;;  %v492_v61 = vmul.f32 %v1670_v25, %v476_v39 }
 0x195   : > { %v1307_v20 = vpack.c.bf16 %v429_v16, %v427_v13  ;;  %v504_v21 = vpop.permute.xlu0 %503  ;;  %v442_v22 = vpop.permute.xlu1 %441  ;;  %v1305_v23 = vpack.c.bf16 %v430_v17, %v428_v14 }
 0x196   : > { %v445_v26 = vsel %vm443_vm7, %v438_v46, %v442_v22  ;;  %v447_v28 = vsel %vm443_vm7, %v442_v22, %v438_v46  ;;  %v508_v6 = vsel %vm507_vm9, %v1604_v45, %v504_v21  ;;  %v510_v7 = vsel %vm507_vm9, %v504_v21, %v1604_v45 }
 0x197   : > { %v461_v32 = vmul.f32 %v1645_v9, %v447_v28  ;;  %v462_v38 = vmul.f32 %v1648_v10, %v445_v26  ;;  %1306 = vmatprep.subr.bf16.mxu1 %v1305_v23  ;;  %v523_v15 = vmul.f32 %v1691_v51, %v510_v7  ;;  %v524_v16 = vmul.f32 %v1694_v54, %v508_v6  ;;  %v1270_v26 = vld [vmem:[%s2071_s1 + $0x6] ss:$8 sm:$0x3] }
 0x198   : > { %1308 = vmatpush1.bf16.msra.mxu1 %v1307_v20  ;;  %v1727_v22 = vrot.slane %v1269_v18, %v1620_v58  ;;  %v1730_v23 = vrot.slane %v1269_v18, %v1622_v59  ;;  %v1746_v31 = vrot.slane %v1270_v26, %v1620_v58 }
 0x199   : > { %v1311_v41 = vpack.c.bf16 %v461_v32, %v459_v29  ;;  %v1688_v42 = vpop.permute.xlu0 %631  ;;  %v474_v44 = vpop.permute.xlu1 %473  ;;  %v1309_v46 = vpack.c.bf16 %v462_v38, %v460_v30  ;;  %v1749_v32 = vrot.slane %v1270_v26, %v1622_v59 }
 0x19a   : > { %v477_v56 = vsel %vm475_vm8, %v470_v48, %v474_v44  ;;  %v479_v43 = vsel %vm475_vm8, %v474_v44, %v470_v48 }
 0x19b   : > { %v493_v2 = vmul.f32 %v1667_v24, %v479_v43  ;;  %v494_v3 = vmul.f32 %v1670_v25, %v477_v56  ;;  %1310 = vmatprep.subr.bf16.mxu1 %v1309_v46 }
 0x19c   : > { %1312 = vmatpush1.bf16.msra.mxu1 %v1311_v41 }
 0x19d   : > { %v1315_v8 = vpack.c.bf16 %v493_v2, %v491_v60  ;;  %v540_v48 = vpop.permute.xlu0 %539  ;;  %v506_v11 = vpop.permute.xlu1 %505  ;;  %v1313_v12 = vpack.c.bf16 %v494_v3, %v492_v61  ;;  %v1775_v60 = vrot.slane %v1271_v35, %v1620_v58  ;;  %v1778_v61 = vrot.slane %v1271_v35, %v1622_v59 }
 0x19e   : > { %v509_v13 = vsel %vm507_vm9, %v1610_v50, %v506_v11  ;;  %v511_v14 = vsel %vm507_vm9, %v506_v11, %v1610_v50  ;;  %v544_v28 = vsel %vm543_vm10, %v1606_v47, %v540_v48  ;;  %v546_v29 = vsel %vm543_vm10, %v540_v48, %v1606_v47 }
 0x19f   : > { %v525_v17 = vmul.f32 %v1691_v51, %v511_v14  ;;  %v526_v45 = vmul.f32 %v1694_v54, %v509_v13  ;;  %1314 = vmatprep.subr.bf16.mxu1 %v1313_v12  ;;  %v559_v39 = vmul.f32 %v1727_v22, %v544_v28  ;;  %v560_v34 = vmul.f32 %v1730_v23, %v546_v29 }
 0x1a0   : > { %1316 = vmatpush1.bf16.msra.mxu1 %v1315_v8 }
 0x1a1   : > { %v1319_v19 = vpack.c.bf16 %v525_v17, %v523_v15  ;;  %v572_v20 = vpop.permute.xlu0 %571  ;;  %v1724_v21 = vpop.permute.xlu1 %633  ;;  %v1317_v50 = vpack.c.bf16 %v526_v45, %v524_v16 }
 0x1a2   : > { %v576_v44 = vsel %vm575_vm11, %v1608_v49, %v572_v20 }
 0x1a3   : > { %1318 = vmatprep.subr.bf16.mxu1 %v1317_v50  ;;  %v591_v33 = vmul.f32 %v1746_v31, %v576_v44 }
 0x1a4   : > { %1320 = vmatpush1.bf16.msra.mxu1 %v1319_v19 }
 0x1a5   : > { %1322 = vmatprep.subr.bf16.mxu1 %v1321_v37  ;;  %v542_v30 = vpop.permute.xlu1 %541  ;;  %v604_v37 = vpop.permute.xlu0 %603 }
 0x1a6   : > { %v545_v38 = vsel %vm543_vm10, %v1614_v53, %v542_v30  ;;  %v547_v47 = vsel %vm543_vm10, %v542_v30, %v1614_v53  ;;  %v578_v53 = vsel %vm575_vm11, %v572_v20, %v1608_v49  ;;  %v1272_v49 = vld [vmem:[%s2071_s1 + $0x10] ss:$8 sm:$0x3]  ;;  %v608_v7 = vsel %vm607_vm12, %v1612_v52, %v604_v37 }
 0x1a7   : > { %v561_v40 = vmul.f32 %v1727_v22, %v545_v38  ;;  %v562_v41 = vmul.f32 %v1730_v23, %v547_v47  ;;  %v1801_v13 = vrot.slane %v1272_v49, %v1620_v58  ;;  %v1804_v14 = vrot.slane %v1272_v49, %v1622_v59 }
 0x1a8   : > { %1324 = vmatpush1.bf16.msra.mxu1 %v1323_v36  ;;  %v592_v36 = vmul.f32 %v1749_v32, %v578_v53  ;;  %v623_v16 = vmul.f32 %v1775_v60, %v608_v7 }
 0x1a9   : > { %v1327_v46 = vpack.c.bf16 %v561_v40, %v559_v39  ;;  %v574_v56 = vpop.permute.xlu1 %573  ;;  %v1325_v43 = vpack.c.bf16 %v562_v41, %v560_v34  ;;  %v636_v8 = vpop.permute.xlu0 %635  ;;  %v1284_v39 = vld [vmem:[%s2073_s3 + $0x10] sm:$0xff] }
 0x1aa   : > { %v577_v2 = vsel %vm575_vm11, %v1618_v57, %v574_v56  ;;  %v579_v27 = vsel %vm575_vm11, %v574_v56, %v1618_v57  ;;  %v610_v57 = vsel %vm607_vm12, %v604_v37, %v1612_v52  ;;  %v640_v59 = vsel %vm639_vm13, %v1688_v42, %v636_v8  ;;  %801 = vperm.xlu1 %1401, %v1284_v39  }
 0x1ab   : > { %v593_v3 = vmul.f32 %v1746_v31, %v577_v2  ;;  %v594_v6 = vmul.f32 %v1749_v32, %v579_v27  ;;  %1326 = vmatprep.subr.bf16.mxu1 %v1325_v43  ;;  %v624_v17 = vmul.f32 %v1778_v61, %v610_v57  ;;  %v642_v18 = vsel %vm639_vm13, %v636_v8, %v1688_v42 }
 0x1ac   : > { %1328 = vmatpush1.bf16.msra.mxu1 %v1327_v46  ;;  %v655_v28 = vmul.f32 %v1801_v13, %v640_v59  ;;  %v656_v29 = vmul.f32 %v1804_v14, %v642_v18  ;;  %v1282_v46 = vld [vmem:[%s2072_s2 + $0x10] sm:$0xff] }
 0x1ad   : > { %v1331_v48 = vpack.c.bf16 %v593_v3, %v591_v33  ;;  %v606_v11 = vpop.permute.xlu1 %605  ;;  %v1329_v12 = vpack.c.bf16 %v594_v6, %v592_v36 }
 0x1ae   : > { %v609_v15 = vsel %vm607_vm12, %v1628_v62, %v606_v11  ;;  %v611_v52 = vsel %vm607_vm12, %v606_v11, %v1628_v62 }
 0x1af   : > { %v625_v45 = vmul.f32 %v1775_v60, %v609_v15  ;;  %v626_v58 = vmul.f32 %v1778_v61, %v611_v52  ;;  %1330 = vmatprep.subr.bf16.mxu1 %v1329_v12 }
 0x1b0   : > { %1332 = vmatpush1.bf16.msra.mxu1 %v1331_v48 }
 0x1b1   : > { %v1335_v19 = vpack.c.bf16 %v625_v45, %v623_v16  ;;  %v638_v62 = vpop.permute.xlu1 %637  ;;  %v1333_v20 = vpack.c.bf16 %v626_v58, %v624_v17 }
 0x1b2   : > { %v641_v50 = vsel %vm639_vm13, %v1724_v21, %v638_v62  ;;  %v643_v26 = vsel %vm639_vm13, %v638_v62, %v1724_v21  ;;  %v663_v21 = vld [vmem:[%s2074_s4] sm:$0xff] }
 0x1b3   : > { %v657_v30 = vmul.f32 %v1801_v13, %v641_v50  ;;  %v658_v42 = vmul.f32 %v1804_v14, %v643_v26  ;;  %1334 = vmatprep.subr.bf16.mxu1 %v1333_v20  ;;  %v1293_v50 = vld [vmem:[%s2074_s4 + $0x18] sm:$0xff]  ;;  %v1294_v26 = vld [vmem:[%s2075_s5 + $0x8] sm:$0xff] }
 0x1b4   : > { %1336 = vmatpush1.bf16.msra.mxu1 %v1335_v19 }
 0x1b5   : > { %v1339_v38 = vpack.c.bf16 %v657_v30, %v655_v28  ;;  %v1337_v47 = vpack.c.bf16 %v658_v42, %v656_v29 }
 0x1b7   : > { %1338 = vmatprep.subr.bf16.mxu1 %v1337_v47 }
 0x1b8   : > { %1340 = vmatpush1.bf16.msra.mxu1 %v1339_v38 }
 0x1ba   : > { %v705_v34 = vpop.permute.xlu0 %704 }
 0x1bb   : > { %776 = vmatmul.mubr.f32.vlgmr.msra.gmra.mrb[4].mxu1 %v663_v21 }
 0x1be   : > { %v807_v36 = vpop.permute.xlu0 %806 }
 0x28e   : > { %v777_v35 = vpop.f32.mrb[4].mxu1 }
 0x28f   : > { %v778_v37 = vadd.f32 %v777_v35, %v705_v34  ;;  %v779_v40 = vpop.f32.mrb[5].mxu1 }
 0x290   : > { %v780_v41 = vadd.f32 %v779_v40, %v705_v34 }
 0x291   : > { %1280 = vst [vmem:[%s1493_s10 + $0x10] sm:$0xff] %v778_v37  ;;  %v1343_v53 = vpack.c.bf16 %v778_v37, %v1497_v5  ;;  %v802_v5 = vpop.permute.xlu1 %801 }
 0x292   : > { %1281 = vst [vmem:[%s1493_s10 + $0x18] sm:$0xff] %v780_v41  ;;  %v1341_v44 = vpack.c.bf16 %v780_v41, %v1495_v4  ;;  %v1283_v4 = vld [vmem:[%s2072_s2 + $0x18] sm:$0xff] }
 0x294   : > { %1342 = vmatprep.subr.bf16.mxu0 %v1341_v44 }
 0x295   : > { %1344 = vmatpush1.bf16.msra.mxu0 %v1343_v53 }
 0x296   : > { %819 = vmatprep.subr.mxu0 %v1426_v0 }
 0x299   : > { %820 = vmatpush1.msra.mxu0 %v1426_v0 }
 0x29a   : > { %1286 = vmatmul.mubr.msk.f32.vlgmr.msra.gmra.mrb[0].mxu0 %vm297_vm0, %v1282_v46 }
 0x29b   : > { %885 = vmatprep.mubr.f32.mxu0 %v1426_v0 }
 0x29e   : > { %1287 = vmatmul.mubr.msk.f32.gmra.mrb[2].mxu0 %vm297_vm0, %v1283_v4 }
 0x29f   : > { %1295 = vmatprep.mubr.msk.f32.mxu0 %vm707_vm5, %v1293_v50 }
 0x36d   : > { %v881_v56 = vpop.f32.mrb[0].mxu0 }
 0x36e   : > { %v882_v43 = vadd.f32 %v881_v56, %v802_v5  ;;  %v883_v2 = vpop.f32.mrb[1].mxu0 }
 0x36f   : > { %v884_v27 = vadd.f32 %v883_v2, %v802_v5 }
 0x370   : > { %v896_v33 = vmul.f32 1.442695, %v882_v43  ;;  %vm892_vm14 = vcmp.gt.f32.partialorder %v882_v43, 0.0 }
 0x371   : > { %v898_v49 = vmul.f32 1.442695, %v884_v27  ;;  %v887_v3 = vpop.f32.mrb[2].mxu0  ;;  %vm893_vm0 = vcmp.gt.f32.partialorder %v884_v27, 0.0 }
 0x372   : > { %1410 = vpow2.f32 %v896_v33  ;;  %v888_v6 = vadd.f32 %v887_v3, %v807_v36  ;;  %v889_v7 = vpop.f32.mrb[3].mxu0 }
 0x373   : > { %1412 = vpow2.f32 %v898_v49  ;;  %v890_v0 = vadd.f32 %v889_v7, %v807_v36 }
 0x374   : > { %v900_v57 = vmul.f32 1.442695, %v888_v6  ;;  %vm894_vm15 = vcmp.gt.f32.partialorder %v888_v6, 0.0 }
 0x375   : > { %v902_v8 = vmul.f32 1.442695, %v890_v0  ;;  %vm895_vm1 = vcmp.gt.f32.partialorder %v890_v0, 0.0 }
 0x376   : > { %1414 = vpow2.f32 %v900_v57 }
 0x377   : > { %1416 = vpow2.f32 %v902_v8 }
 0x37c   : > { %v1411_v48 = vpop.eup %1410 }
 0x37d   : > { %v1413_v11 = vpop.eup %1412  ;;  %v1288_v12 = vadd.f32 -1.0, %v1411_v48 }
 0x37e   : > { %v1289_v16 = vadd.f32 -1.0, %v1413_v11 }
 0x37f   : > { %v1853_v15 = vsel %vm892_vm14, %v882_v43, %v1288_v12 }
 0x380   : > { %v1415_v52 = vpop.eup %1414  ;;  %912 = vrot.lane.b32.xlu1 %v1853_v15, %s1429_s16  ;;  %v1859_v18 = vsel %vm893_vm0, %v884_v27, %v1289_v16 }
 0x381   : > { %v1417_v17 = vpop.eup %1416  ;;  %v1290_v45 = vadd.f32 -1.0, %v1415_v52 }
 0x382   : > { %v1291_v58 = vadd.f32 -1.0, %v1417_v17 }
 0x383   : > { %v1857_v59 = vsel %vm894_vm15, %v888_v6, %v1290_v45 }
 0x384   : > { %v1861_v19 = vsel %vm895_vm1, %v890_v0, %v1291_v58  ;;  %914 = vrot.lane.b32.xlu0 %v1857_v59, %s1429_s16  ;;  %932 = vrot.lane.b32.xlu1 %v1853_v15, %s1428_s15  ;;  %v1363_v62 = vpack.c.bf16 %v1857_v59, %v1853_v15 }
 0x385   : > { %v1361_v20 = vpack.c.bf16 %v1861_v19, %v1859_v18 }
 0x388   : > { %934 = vrot.lane.b32.xlu0 %v1857_v59, %s1428_s15  ;;  %952 = vrot.lane.b32.xlu1 %v1853_v15, %s1430_s17 }
 0x38c   : > { %954 = vrot.lane.b32.xlu0 %v1857_v59, %s1430_s17  ;;  %972 = vrot.lane.b32.xlu1 %v1853_v15, %s1431_s18 }
 0x390   : > { %974 = vrot.lane.b32.xlu0 %v1857_v59, %s1431_s18  ;;  %996 = vrot.lane.b32.xlu1 %v1853_v15, %s1432_s19 }
 0x394   : > { %998 = vrot.lane.b32.xlu0 %v1857_v59, %s1432_s19  ;;  %1016 = vrot.lane.b32.xlu1 %v1853_v15, %s1433_s20 }
 0x398   : > { %1018 = vrot.lane.b32.xlu0 %v1857_v59, %s1433_s20  ;;  %1036 = vrot.lane.b32.xlu1 %v1853_v15, %s1434_s22 }
 0x39c   : > { %1038 = vrot.lane.b32.xlu0 %v1857_v59, %s1434_s22  ;;  %916 = vrot.lane.b32.xlu1 %v1859_v18, %s1429_s16 }
 0x3a0   : > { %918 = vrot.lane.b32.xlu0 %v1861_v19, %s1429_s16  ;;  %936 = vrot.lane.b32.xlu1 %v1859_v18, %s1428_s15 }
 0x3a4   : > { %938 = vrot.lane.b32.xlu0 %v1861_v19, %s1428_s15  ;;  %956 = vrot.lane.b32.xlu1 %v1859_v18, %s1430_s17 }
 0x3a8   : > { %958 = vrot.lane.b32.xlu0 %v1861_v19, %s1430_s17  ;;  %976 = vrot.lane.b32.xlu1 %v1859_v18, %s1431_s18 }
 0x3ac   : > { %978 = vrot.lane.b32.xlu0 %v1861_v19, %s1431_s18  ;;  %1056 = vrot.lane.b32.xlu1 %v1853_v15, %s1435_s23 }
 0x3b0   : > { %1058 = vrot.lane.b32.xlu0 %v1857_v59, %s1435_s23  ;;  %1000 = vrot.lane.b32.xlu1 %v1859_v18, %s1432_s19 }
 0x3b4   : > { %1002 = vrot.lane.b32.xlu0 %v1861_v19, %s1432_s19  ;;  %1020 = vrot.lane.b32.xlu1 %v1859_v18, %s1433_s20 }
 0x3b8   : > { %1022 = vrot.lane.b32.xlu0 %v1861_v19, %s1433_s20  ;;  %1040 = vrot.lane.b32.xlu1 %v1859_v18, %s1434_s22 }
 0x3bc   : > { %1042 = vrot.lane.b32.xlu0 %v1861_v19, %s1434_s22  ;;  %1060 = vrot.lane.b32.xlu1 %v1859_v18, %s1435_s23 }
 0x3c0   : > { %1062 = vrot.lane.b32.xlu0 %v1861_v19, %s1435_s23  ;;  %1119 = vperm.xlu1 %1401, %v1294_v26  }
 0x3f2   : > { %v913_v28 = vpop.permute.xlu1 %912 }
 0x3f6   : > { %v915_v29 = vpop.permute.xlu0 %914  ;;  %v933_v30 = vpop.permute.xlu1 %932 }
 0x3fa   : > { %v935_v42 = vpop.permute.xlu0 %934  ;;  %v953_v38 = vpop.permute.xlu1 %952 }
 0x3fe   : > { %v955_v47 = vpop.permute.xlu0 %954  ;;  %v973_v21 = vpop.permute.xlu1 %972 }
 0x402   : > { %v975_v39 = vpop.permute.xlu0 %974  ;;  %v1936_v34 = vpop.permute.xlu1 %996 }
 0x406   : > { %v1938_v35 = vpop.permute.xlu0 %998  ;;  %v1940_v37 = vpop.permute.xlu1 %1016 }
 0x40a   : > { %v1942_v40 = vpop.permute.xlu0 %1018  ;;  %v1944_v41 = vpop.permute.xlu1 %1036 }
 0x40e   : > { %v1946_v44 = vpop.permute.xlu0 %1038  ;;  %v917_v53 = vpop.permute.xlu1 %916 }
 0x40f   : > { %v920_v46 = vsel %vm411_vm6, %v913_v28, %v917_v53  ;;  %v922_v4 = vsel %vm411_vm6, %v917_v53, %v913_v28 }
 0x410   : > { %v924_v27 = vmul.f32 %v922_v4, %v1631_v63  ;;  %v925_v33 = vmul.f32 %v920_v46, %v1634_v1 }
 0x412   : > { %v919_v5 = vpop.permute.xlu0 %918  ;;  %v937_v56 = vpop.permute.xlu1 %936 }
 0x413   : > { %v921_v43 = vsel %vm411_vm6, %v915_v29, %v919_v5  ;;  %v923_v2 = vsel %vm411_vm6, %v919_v5, %v915_v29  ;;  %v940_v3 = vsel %vm443_vm7, %v933_v30, %v937_v56  ;;  %v942_v6 = vsel %vm443_vm7, %v937_v56, %v933_v30 }
 0x414   : > { %v926_v36 = vmul.f32 %v923_v2, %v1631_v63  ;;  %v927_v49 = vmul.f32 %v921_v43, %v1634_v1  ;;  %v944_v63 = vmul.f32 %v942_v6, %v1645_v9  ;;  %v945_v1 = vmul.f32 %v940_v3, %v1648_v10 }
 0x416   : > { %v1347_v7 = vpack.c.bf16 %v926_v36, %v924_v27  ;;  %v939_v0 = vpop.permute.xlu0 %938  ;;  %v957_v57 = vpop.permute.xlu1 %956  ;;  %v1345_v8 = vpack.c.bf16 %v927_v49, %v925_v33 }
 0x417   : > { %v941_v48 = vsel %vm443_vm7, %v935_v42, %v939_v0  ;;  %v943_v11 = vsel %vm443_vm7, %v939_v0, %v935_v42  ;;  %v960_v16 = vsel %vm475_vm8, %v953_v38, %v957_v57  ;;  %v962_v17 = vsel %vm475_vm8, %v957_v57, %v953_v38 }
 0x418   : > { %v946_v12 = vmul.f32 %v943_v11, %v1645_v9  ;;  %v947_v52 = vmul.f32 %v941_v48, %v1648_v10  ;;  %1346 = vmatprep.subr.bf16.mxu0 %v1345_v8  ;;  %v964_v10 = vmul.f32 %v962_v17, %v1667_v24  ;;  %v965_v29 = vmul.f32 %v960_v16, %v1670_v25 }
 0x419   : > { %1348 = vmatpush1.bf16.msra.mxu0 %v1347_v7 }
 0x41a   : > { %v1351_v45 = vpack.c.bf16 %v946_v12, %v944_v63  ;;  %v959_v58 = vpop.permute.xlu0 %958  ;;  %v977_v50 = vpop.permute.xlu1 %976  ;;  %v1349_v26 = vpack.c.bf16 %v947_v52, %v945_v1 }
 0x41b   : > { %v961_v28 = vsel %vm475_vm8, %v955_v47, %v959_v58  ;;  %v963_v9 = vsel %vm475_vm8, %v959_v58, %v955_v47  ;;  %v980_v38 = vsel %vm507_vm9, %v973_v21, %v977_v50  ;;  %v982_v53 = vsel %vm507_vm9, %v977_v50, %v973_v21 }
 0x41c   : > { %v966_v30 = vmul.f32 %v963_v9, %v1667_v24  ;;  %v967_v42 = vmul.f32 %v961_v28, %v1670_v25  ;;  %1350 = vmatprep.subr.bf16.mxu0 %v1349_v26  ;;  %v984_v25 = vmul.f32 %v982_v53, %v1691_v51  ;;  %v985_v43 = vmul.f32 %v980_v38, %v1694_v54 }
 0x41d   : > { %1352 = vmatpush1.bf16.msra.mxu0 %v1351_v45 }
 0x41e   : > { %v1355_v46 = vpack.c.bf16 %v966_v30, %v964_v10  ;;  %v979_v4 = vpop.permute.xlu0 %978  ;;  %v1057_v5 = vpop.permute.xlu1 %1056  ;;  %v1353_v47 = vpack.c.bf16 %v967_v42, %v965_v29 }
 0x41f   : > { %v981_v56 = vsel %vm507_vm9, %v975_v39, %v979_v4  ;;  %v983_v24 = vsel %vm507_vm9, %v979_v4, %v975_v39 }
 0x420   : > { %v986_v2 = vmul.f32 %v983_v24, %v1691_v51  ;;  %v987_v27 = vmul.f32 %v981_v56, %v1694_v54  ;;  %1354 = vmatprep.subr.bf16.mxu0 %v1353_v47 }
 0x421   : > { %1356 = vmatpush1.bf16.msra.mxu0 %v1355_v46 }
 0x422   : > { %v1359_v21 = vpack.c.bf16 %v986_v2, %v984_v25  ;;  %v1059_v33 = vpop.permute.xlu0 %1058  ;;  %v1001_v36 = vpop.permute.xlu1 %1000  ;;  %v1357_v49 = vpack.c.bf16 %v987_v27, %v985_v43 }
 0x423   : > { %v1004_v3 = vsel %vm543_vm10, %v1936_v34, %v1001_v36  ;;  %v1006_v39 = vsel %vm543_vm10, %v1001_v36, %v1936_v34 }
 0x424   : > { %1358 = vmatprep.subr.bf16.mxu0 %v1357_v49  ;;  %v1008_v0 = vmul.f32 %v1004_v3, %v1727_v22  ;;  %v1009_v57 = vmul.f32 %v1006_v39, %v1730_v23 }
 0x425   : > { %1360 = vmatpush1.bf16.msra.mxu0 %v1359_v21 }
 0x426   : > { %v1003_v6 = vpop.permute.xlu0 %1002  ;;  %1362 = vmatprep.subr.bf16.mxu0 %v1361_v20  ;;  %v1021_v51 = vpop.permute.xlu1 %1020 }
 0x427   : > { %v1005_v54 = vsel %vm543_vm10, %v1938_v35, %v1003_v6  ;;  %v1007_v7 = vsel %vm543_vm10, %v1003_v6, %v1938_v35  ;;  %v1024_v18 = vsel %vm575_vm11, %v1940_v37, %v1021_v51  ;;  %v1026_v19 = vsel %vm575_vm11, %v1021_v51, %v1940_v37 }
 0x428   : > { %v1010_v34 = vmul.f32 %v1005_v54, %v1727_v22  ;;  %v1011_v8 = vmul.f32 %v1007_v7, %v1730_v23  ;;  %v1028_v63 = vmul.f32 %v1024_v18, %v1746_v31  ;;  %v1029_v37 = vmul.f32 %v1026_v19, %v1749_v32 }
 0x429   : > { %1364 = vmatpush1.bf16.msra.mxu0 %v1363_v62 }
 0x42a   : > { %v1367_v20 = vpack.c.bf16 %v1010_v34, %v1008_v0  ;;  %v1023_v35 = vpop.permute.xlu0 %1022  ;;  %v1041_v48 = vpop.permute.xlu1 %1040  ;;  %v1365_v11 = vpack.c.bf16 %v1011_v8, %v1009_v57 }
 0x42b   : > { %v1025_v22 = vsel %vm575_vm11, %v1942_v40, %v1023_v35  ;;  %v1027_v23 = vsel %vm575_vm11, %v1023_v35, %v1942_v40  ;;  %v1044_v59 = vsel %vm607_vm12, %v1944_v41, %v1041_v48  ;;  %v1046_v62 = vsel %vm607_vm12, %v1041_v48, %v1944_v41 }
 0x42c   : > { %v1030_v1 = vmul.f32 %v1025_v22, %v1746_v31  ;;  %v1031_v15 = vmul.f32 %v1027_v23, %v1749_v32  ;;  %1366 = vmatprep.subr.bf16.mxu0 %v1365_v11  ;;  %v1048_v17 = vmul.f32 %v1044_v59, %v1775_v60  ;;  %v1049_v45 = vmul.f32 %v1046_v62, %v1778_v61 }
 0x42d   : > { %1368 = vmatpush1.bf16.msra.mxu0 %v1367_v20 }
 0x42e   : > { %v1371_v12 = vpack.c.bf16 %v1030_v1, %v1028_v63  ;;  %v1043_v40 = vpop.permute.xlu0 %1042  ;;  %v1061_v52 = vpop.permute.xlu1 %1060  ;;  %v1369_v16 = vpack.c.bf16 %v1031_v15, %v1029_v37 }
 0x42f   : > { %v1045_v31 = vsel %vm607_vm12, %v1946_v44, %v1043_v40  ;;  %v1047_v32 = vsel %vm607_vm12, %v1043_v40, %v1946_v44  ;;  %v1064_v50 = vsel %vm639_vm13, %v1057_v5, %v1061_v52  ;;  %v1066_v26 = vsel %vm639_vm13, %v1061_v52, %v1057_v5 }
 0x430   : > { %v1050_v58 = vmul.f32 %v1045_v31, %v1775_v60  ;;  %v1051_v41 = vmul.f32 %v1047_v32, %v1778_v61  ;;  %1370 = vmatprep.subr.bf16.mxu0 %v1369_v16  ;;  %v1068_v60 = vmul.f32 %v1064_v50, %v1801_v13  ;;  %v1069_v61 = vmul.f32 %v1066_v26, %v1804_v14 }
 0x431   : > { %1372 = vmatpush1.bf16.msra.mxu0 %v1371_v12 }
 0x432   : > { %v1375_v28 = vpack.c.bf16 %v1050_v58, %v1048_v17  ;;  %v1063_v9 = vpop.permute.xlu0 %1062  ;;  %v1373_v10 = vpack.c.bf16 %v1051_v41, %v1049_v45 }
 0x433   : > { %v1065_v44 = vsel %vm639_vm13, %v1059_v33, %v1063_v9  ;;  %v1067_v29 = vsel %vm639_vm13, %v1063_v9, %v1059_v33 }
 0x434   : > { %v1070_v30 = vmul.f32 %v1065_v44, %v1801_v13  ;;  %v1071_v42 = vmul.f32 %v1067_v29, %v1804_v14  ;;  %1374 = vmatprep.subr.bf16.mxu0 %v1373_v10 }
 0x435   : > { %1376 = vmatpush1.bf16.msra.mxu0 %v1375_v28 }
 0x436   : > { %v1379_v38 = vpack.c.bf16 %v1070_v30, %v1068_v60  ;;  %v1377_v53 = vpack.c.bf16 %v1071_v42, %v1069_v61 }
 0x438   : > { %1378 = vmatprep.subr.bf16.mxu0 %v1377_v53 }
 0x439   : > { %1380 = vmatpush1.bf16.msra.mxu0 %v1379_v38 }
 0x43c   : > { %1190 = vmatmul.mubr.f32.vlgmr.msra.gmra.mrb[4].mxu0 %v1292_v55 }
 0x43f   : > { %v1120_v46 = vpop.permute.xlu1 %1119 }
 0x50f   : > { %v1191_v4 = vpop.f32.mrb[4].mxu0 }
 0x510   : > { %v1192_v5 = vadd.f32 %v1191_v4, %v1120_v46  ;;  %v1193_v47 = vpop.f32.mrb[5].mxu0 }
 0x511   : > { %v1194_v56 = vadd.f32 %v1193_v47, %v1120_v46 }
 0x512   : > { %1296 = vst [vmem:[%s1493_s10 + $0x20] sm:$0xff] %v1192_v5 }
 0x513   : > { %1297 = vst [vmem:[%s1493_s10 + $0x28] sm:$0xff] %v1194_v56 }
 0x514 PF: > { %s16_s21 = sadd.s32 1, %s1424_s21  }
 0x515   : > { %p13_p4 = scmp.ge.s32.totalorder %s16_s21, 4  }
 0x517   :  { %15 = sbr.rel (!%p13_p4) target bundleno = 1 (0x1), region = 87 }

</bundles_post_ra>
